<compile_context>
chip_gen: v6e
topology: v6e:2x2x1
jax: 0.10.0
libtpu: 0.0.40
codegen_flags: <defaults>
</compile_context>

<pallas_src>
import jax
import jax.numpy as jnp
from jax.experimental import pallas as pl
from jax.experimental.pallas import tpu as pltpu


def _mobile_former_kernel(lf_ref, x_ref, wq_ref, bq_ref, wu_ref, bu_ref, o_ref):
    # lf_ref: (TB, C, L) bf16   x_ref: (TB, M, D) f32
    # wq_ref: (D, C)     bf16   bq_ref: (1, C)    f32   (scale folded in)
    # wu_ref: (C, D)     bf16   bu_ref: (1, D)    f32
    # o_ref : (TB, M, D) f32
    tb, m, d = x_ref.shape
    c = lf_ref.shape[1]

    x_f32 = x_ref[...]                          # keep f32 for the residual add
    x_bf = x_f32.astype(jnp.bfloat16)
    lf = lf_ref[...]                            # (TB, C, L), lane dim = L, bf16

    # project_Q for all folded batches as one row-folded MXU dot:
    #   (TB*M, D) @ (D, C) -> (TB*M, C).  c**-0.5 is already folded into Wq/bq.
    q = jnp.dot(x_bf.reshape(tb * m, d), wq_ref[...],
                preferred_element_type=jnp.float32) + bq_ref[...]
    q = q.reshape(tb, m, c)

    # scores = q . lf, contracting C (no transpose of lf needed): (TB, M, L)
    scores = jnp.einsum('bmc,bcl->bml', q.astype(jnp.bfloat16), lf,
                        preferred_element_type=jnp.float32)

    # softmax over L (f32 VPU/EUP math; reciprocal on the otherwise-idle EUP slot)
    scores = scores - jnp.max(scores, axis=-1, keepdims=True)
    p = jnp.exp(scores)
    p = p * pl.reciprocal(jnp.sum(p, axis=-1, keepdims=True), approx=True)

    # fusion = p . lf, contracting L (both lane axes -> trans_b form on the MXU)
    fusion = jnp.einsum('bml,bcl->bmc', p.astype(jnp.bfloat16), lf,
                        preferred_element_type=jnp.float32)

    # unproject (row-folded): (TB*M, C) @ (C, D) + bias, then residual add (f32)
    unproj = jnp.dot(fusion.reshape(tb * m, c).astype(jnp.bfloat16), wu_ref[...],
                     preferred_element_type=jnp.float32) + bu_ref[...]
    o_ref[...] = (unproj.reshape(tb, m, d) + x_f32).astype(o_ref.dtype)


def _pick_batch_tile(n, per_batch_bytes, target_bytes=2 << 20):
    """Largest divisor of n whose per-step payload stays under target_bytes."""
    best = 1
    for t in range(1, n + 1):
        if n % t == 0 and t * per_batch_bytes <= target_bytes:
            best = t
    return best


def mobile_former(local_feature_nchw, x, wq, bq, wu, bu, *, batch_tile=None):
    """local_feature_nchw: (N, C, H, W), x: (N, M, D).  Returns (N, M, D)."""
    n, c, h, w = local_feature_nchw.shape
    _, m, d = x.shape
    l = h * w

    # (N, C, H, W) -> (N, C, L): pure reshape, no HBM transpose / extra pass.
    # Cast the big lf slab and the shared weights to bf16 for the MXU; biases
    # stay f32 (added post-dot).  Fold the c**-0.5 attention scale into Wq/bq.
    scale = c ** -0.5
    lf = local_feature_nchw.reshape(n, c, l).astype(jnp.bfloat16)
    wq_s = (wq * scale).astype(jnp.bfloat16)
    bq_s = (bq * scale).reshape(1, c).astype(jnp.float32)
    wu_c = wu.astype(jnp.bfloat16)
    bu_c = bu.reshape(1, d).astype(jnp.float32)

    lf_item = jnp.dtype(jnp.bfloat16).itemsize
    x_item = jnp.dtype(x.dtype).itemsize
    per_batch_bytes = c * l * lf_item + 2 * m * d * x_item  # lf + x + out

    if batch_tile is None:
        batch_tile = _pick_batch_tile(n, per_batch_bytes)
    assert n % batch_tile == 0, "batch_tile must divide batch"

    grid = (n // batch_tile,)

    # Explicit scoped-VMEM budget: double-buffered lf/x/out tiles + weights +
    # headroom for the f32 intermediates (scores/p are (TB, M, L) f32).
    tile_bytes = batch_tile * per_batch_bytes
    interm_bytes = 3 * batch_tile * m * l * 4
    weight_bytes = (wq_s.size + wu_c.size) * lf_item + (bq_s.size + bu_c.size) * 4
    vmem_need = 2 * tile_bytes + interm_bytes + weight_bytes + (4 << 20)
    vmem_limit = int(min(48 << 20, max(16 << 20, vmem_need)))

    out = pl.pallas_call(
        _mobile_former_kernel,
        out_shape=jax.ShapeDtypeStruct((n, m, d), x.dtype),
        grid_spec=pltpu.PrefetchScalarGridSpec(
            num_scalar_prefetch=0,
            grid=grid,
            in_specs=[
                pl.BlockSpec((batch_tile, c, l), lambda i: (i, 0, 0)),  # LF slab
                pl.BlockSpec((batch_tile, m, d), lambda i: (i, 0, 0)),  # tokens
                pl.BlockSpec((d, c), lambda i: (0, 0)),  # Wq (constant -> resident)
                pl.BlockSpec((1, c), lambda i: (0, 0)),  # bq
                pl.BlockSpec((c, d), lambda i: (0, 0)),  # Wu
                pl.BlockSpec((1, d), lambda i: (0, 0)),  # bu
            ],
            out_specs=pl.BlockSpec((batch_tile, m, d), lambda i: (i, 0, 0)),
        ),
        compiler_params=pltpu.CompilerParams(
            dimension_semantics=("parallel",),
            vmem_limit_bytes=vmem_limit),
    )(lf, x, wq_s, bq_s, wu_c, bu_c)
    return out


def mobile_former_ref(local_feature_nchw, x, wq, bq, wu, bu):
    n, c, h, w = local_feature_nchw.shape
    lf = jnp.transpose(local_feature_nchw.reshape(n, c, h * w), (0, 2, 1))
    q = jnp.einsum('nmd,dc->nmc', x, wq) + bq
    scores = jnp.einsum('nmc,nlc->nml', q, lf) * (c ** -0.5)
    p = jax.nn.softmax(scores, axis=-1)
    fusion = jnp.einsum('nml,nlc->nmc', p, lf)
    return jnp.einsum('nmc,cd->nmd', fusion, wu) + bu + x


if __name__ == "__main__":
    key = jax.random.PRNGKey(0)
    k1, k2, k3, k4, k5, k6 = jax.random.split(key, 6)

    N, C, H, W = 2, 8, 8, 8        # in_channel = 8, spatial 8x8 -> L = 64
    M, D = 8, 32                   # M tokens of dim d_model = 32

    local_feature = jax.random.normal(k1, (N, C, H, W), dtype=jnp.float32)
    x = jax.random.normal(k2, (N, M, D), dtype=jnp.float32)

    # project_Q: Linear(d_model -> in_channel); unproject: Linear(in_channel -> d_model)
    wq = jax.random.normal(k3, (D, C), dtype=jnp.float32) * 0.1
    bq = jax.random.normal(k4, (C,), dtype=jnp.float32) * 0.1
    wu = jax.random.normal(k5, (C, D), dtype=jnp.float32) * 0.1
    bu = jax.random.normal(k6, (D,), dtype=jnp.float32) * 0.1

    out = mobile_former(local_feature, x, wq, bq, wu, bu)
    out = jax.block_until_ready(out)

    ref = mobile_former_ref(local_feature, x, wq, bq, wu, bu)
    assert out.shape == (N, M, D)
    # tolerance accounts for bf16 MXU operands (f32 accumulation) and the
    # approximate EUP reciprocal in the softmax denominator
    assert jnp.allclose(out, ref, atol=2e-2, rtol=2e-2), "mismatch vs reference"

    print("KERNEL_OK")
</pallas_src>

<mosaic_0001>
module attributes {stable_mosaic.version = 11 : i64} {
  func.func @_mobile_former_kernel(%arg0: i32, %arg1: memref<2x8x64xbf16, #tpu.memory_space<vmem>>, %arg2: memref<2x8x32xf32, #tpu.memory_space<vmem>>, %arg3: memref<32x8xbf16, #tpu.memory_space<vmem>>, %arg4: memref<1x8xf32, #tpu.memory_space<vmem>>, %arg5: memref<8x32xbf16, #tpu.memory_space<vmem>>, %arg6: memref<1x32xf32, #tpu.memory_space<vmem>>, %arg7: memref<2x8x32xf32, #tpu.memory_space<vmem>>) attributes {dimension_semantics = [#tpu.dimension_semantics<parallel>], iteration_bounds = array<i64: 1>, scalar_prefetch = 0 : i64, scratch_operands = 0 : i64, tpu.core_type = #tpu.core_type<tc>, window_params = [{transform_indices = @transform_0, window_bounds = array<i64: 2, 8, 64>}, {transform_indices = @transform_1, window_bounds = array<i64: 2, 8, 32>}, {pipeline_mode = #tpu.pipeline_mode<synchronous>, transform_indices = @transform_2, window_bounds = array<i64: 32, 8>}, {pipeline_mode = #tpu.pipeline_mode<synchronous>, transform_indices = @transform_3, window_bounds = array<i64: 1, 8>}, {pipeline_mode = #tpu.pipeline_mode<synchronous>, transform_indices = @transform_4, window_bounds = array<i64: 8, 32>}, {pipeline_mode = #tpu.pipeline_mode<synchronous>, transform_indices = @transform_5, window_bounds = array<i64: 1, 32>}, {transform_indices = @transform_6, window_bounds = array<i64: 2, 8, 32>}]} {
    %c0 = arith.constant 0 : index
    %c0_0 = arith.constant 0 : index
    %c0_1 = arith.constant 0 : index
    %0 = vector.load %arg2[%c0, %c0_0, %c0_1] : memref<2x8x32xf32, #tpu.memory_space<vmem>>, vector<2x8x32xf32>
    %1 = arith.truncf %0 : vector<2x8x32xf32> to vector<2x8x32xbf16>
    %c0_2 = arith.constant 0 : index
    %c0_3 = arith.constant 0 : index
    %c0_4 = arith.constant 0 : index
    %2 = vector.load %arg1[%c0_2, %c0_3, %c0_4] : memref<2x8x64xbf16, #tpu.memory_space<vmem>>, vector<2x8x64xbf16>
    %3 = vector.shape_cast %1 : vector<2x8x32xbf16> to vector<16x32xbf16>
    %c0_5 = arith.constant 0 : index
    %c0_6 = arith.constant 0 : index
    %4 = vector.load %arg3[%c0_5, %c0_6] : memref<32x8xbf16, #tpu.memory_space<vmem>>, vector<32x8xbf16>
    %cst = arith.constant dense<0.000000e+00> : vector<16x8xf32>
    %5 = tpu.matmul %3, %4, %cst {dimension_numbers = #tpu.dot_dimension_numbers<[1], [0], [0], [1], [0, 0, 1, 1], [], []>} : vector<16x32xbf16>, vector<32x8xbf16>, vector<16x8xf32> -> vector<16x8xf32>
    %c0_7 = arith.constant 0 : index
    %c0_8 = arith.constant 0 : index
    %6 = vector.load %arg4[%c0_7, %c0_8] : memref<1x8xf32, #tpu.memory_space<vmem>>, vector<1x8xf32>
    %7 = vector.broadcast %6 : vector<1x8xf32> to vector<16x8xf32>
    %8 = arith.addf %5, %7 : vector<16x8xf32>
    %9 = vector.shape_cast %8 : vector<16x8xf32> to vector<2x8x8xf32>
    %10 = arith.truncf %9 : vector<2x8x8xf32> to vector<2x8x8xbf16>
    "tpu.trace_start"() <{level = 10 : i32, message = "bmc,bcl->bml"}> : () -> ()
    %cst_9 = arith.constant dense<0.000000e+00> : vector<2x8x64xf32>
    %11 = tpu.matmul %10, %2, %cst_9 {dimension_numbers = #tpu.dot_dimension_numbers<[2], [1], [1], [2], [0, 0, 0, 1, 1, 2], [0], [0]>} : vector<2x8x8xbf16>, vector<2x8x64xbf16>, vector<2x8x64xf32> -> vector<2x8x64xf32>
    "tpu.trace_stop"() : () -> ()
    %cst_10 = arith.constant dense<0xFF800000> : vector<2x8xf32>
    %12 = vector.multi_reduction <maximumf>, %11, %cst_10 [2] : vector<2x8x64xf32> to vector<2x8xf32>
    %13 = vector.shape_cast %12 : vector<2x8xf32> to vector<2x8x1xf32>
    %14 = vector.broadcast %13 : vector<2x8x1xf32> to vector<2x8x64xf32>
    %15 = arith.subf %11, %14 : vector<2x8x64xf32>
    %16 = math.exp %15 : vector<2x8x64xf32>
    %cst_11 = arith.constant dense<0.000000e+00> : vector<2x8xf32>
    %17 = vector.multi_reduction <add>, %16, %cst_11 [2] : vector<2x8x64xf32> to vector<2x8xf32>
    %18 = vector.shape_cast %17 : vector<2x8xf32> to vector<2x8x1xf32>
    %19 = tpu.reciprocal %18 {approx = true} : vector<2x8x1xf32> -> vector<2x8x1xf32>
    %20 = vector.broadcast %19 : vector<2x8x1xf32> to vector<2x8x64xf32>
    %21 = arith.mulf %16, %20 : vector<2x8x64xf32>
    %22 = arith.truncf %21 : vector<2x8x64xf32> to vector<2x8x64xbf16>
    "tpu.trace_start"() <{level = 10 : i32, message = "bml,bcl->bmc"}> : () -> ()
    %cst_12 = arith.constant dense<0.000000e+00> : vector<2x8x8xf32>
    %23 = tpu.matmul %22, %2, %cst_12 {dimension_numbers = #tpu.dot_dimension_numbers<[2], [2], [1], [1], [0, 0, 0, 1, 1, 1], [0], [0]>} : vector<2x8x64xbf16>, vector<2x8x64xbf16>, vector<2x8x8xf32> -> vector<2x8x8xf32>
    "tpu.trace_stop"() : () -> ()
    %24 = vector.shape_cast %23 : vector<2x8x8xf32> to vector<16x8xf32>
    %25 = arith.truncf %24 : vector<16x8xf32> to vector<16x8xbf16>
    %c0_13 = arith.constant 0 : index
    %c0_14 = arith.constant 0 : index
    %26 = vector.load %arg5[%c0_13, %c0_14] : memref<8x32xbf16, #tpu.memory_space<vmem>>, vector<8x32xbf16>
    %cst_15 = arith.constant dense<0.000000e+00> : vector<16x32xf32>
    %27 = tpu.matmul %25, %26, %cst_15 {dimension_numbers = #tpu.dot_dimension_numbers<[1], [0], [0], [1], [0, 0, 1, 1], [], []>} : vector<16x8xbf16>, vector<8x32xbf16>, vector<16x32xf32> -> vector<16x32xf32>
    %c0_16 = arith.constant 0 : index
    %c0_17 = arith.constant 0 : index
    %28 = vector.load %arg6[%c0_16, %c0_17] : memref<1x32xf32, #tpu.memory_space<vmem>>, vector<1x32xf32>
    %29 = vector.broadcast %28 : vector<1x32xf32> to vector<16x32xf32>
    %30 = arith.addf %27, %29 : vector<16x32xf32>
    %31 = vector.shape_cast %30 : vector<16x32xf32> to vector<2x8x32xf32>
    %32 = arith.addf %31, %0 : vector<2x8x32xf32>
    %c0_18 = arith.constant 0 : index
    %c0_19 = arith.constant 0 : index
    %c0_20 = arith.constant 0 : index
    %33 = vector.load %arg7[%c0_18, %c0_19, %c0_20] : memref<2x8x32xf32, #tpu.memory_space<vmem>>, vector<2x8x32xf32>
    tpu.vector_store %arg7[%c0_18, %c0_19, %c0_20], %32 {strides = array<i32>} : memref<2x8x32xf32, #tpu.memory_space<vmem>>, vector<2x8x32xf32>,
    return
  }
  func.func @transform_0(%arg0: i32) -> (i32, i32, i32) {
    %c0_i32 = arith.constant 0 : i32
    %c0_i32_0 = arith.constant 0 : i32
    %c0_i32_1 = arith.constant 0 : i32
    return %arg0, %c0_i32, %c0_i32_0 : i32, i32, i32
  }
  func.func @transform_1(%arg0: i32) -> (i32, i32, i32) {
    %c0_i32 = arith.constant 0 : i32
    %c0_i32_0 = arith.constant 0 : i32
    %c0_i32_1 = arith.constant 0 : i32
    return %arg0, %c0_i32, %c0_i32_0 : i32, i32, i32
  }
  func.func @transform_2(%arg0: i32) -> (i32, i32) {
    %c0_i32 = arith.constant 0 : i32
    %c0_i32_0 = arith.constant 0 : i32
    %c0_i32_1 = arith.constant 0 : i32
    return %c0_i32, %c0_i32_0 : i32, i32
  }
  func.func @transform_3(%arg0: i32) -> (i32, i32) {
    %c0_i32 = arith.constant 0 : i32
    %c0_i32_0 = arith.constant 0 : i32
    %c0_i32_1 = arith.constant 0 : i32
    return %c0_i32, %c0_i32_0 : i32, i32
  }
  func.func @transform_4(%arg0: i32) -> (i32, i32) {
    %c0_i32 = arith.constant 0 : i32
    %c0_i32_0 = arith.constant 0 : i32
    %c0_i32_1 = arith.constant 0 : i32
    return %c0_i32, %c0_i32_0 : i32, i32
  }
  func.func @transform_5(%arg0: i32) -> (i32, i32) {
    %c0_i32 = arith.constant 0 : i32
    %c0_i32_0 = arith.constant 0 : i32
    %c0_i32_1 = arith.constant 0 : i32
    return %c0_i32, %c0_i32_0 : i32, i32
  }
  func.func @transform_6(%arg0: i32) -> (i32, i32, i32) {
    %c0_i32 = arith.constant 0 : i32
    %c0_i32_0 = arith.constant 0 : i32
    %c0_i32_1 = arith.constant 0 : i32
    return %arg0, %c0_i32, %c0_i32_0 : i32, i32, i32
  }
}

</mosaic_0001>

<bundles_post_ra>
// kernel: tpu_custom_call.1
= control target key start
LH: loop header
LB: loop body
LE: loop exit
PB: predicated region body
PF: predicated region fallthrough
CT: control target
= control target key end

     0   :  { %11 = vsyncpa [#allocation3], 0  ;;  %s645_s0 = inlined_call_operand.hbm [shape: bf16[2,8,64], index: 0, kind: input, shape index: {}]   ;;  %s646_s1 = inlined_call_operand.vmem [shape: f32[2,8,32], index: 1, kind: input, shape index: {}]   ;;  %s647_s2 = inlined_call_operand.vmem [shape: bf16[32,8], index: 2, kind: input, shape index: {}]   ;;  %s648_s3 = inlined_call_operand.vmem [shape: f32[1,8], index: 3, kind: input, shape index: {}]   ;;  %s649_s4 = inlined_call_operand.vmem [shape: bf16[8,32], index: 4, kind: input, shape index: {}]   ;;  %s650_s5 = inlined_call_operand.vmem [shape: f32[1,32], index: 5, kind: input, shape index: {}]   ;;  %s651_s6 = inlined_call_operand.hbm [shape: f32[2,8,32], index: 6, kind: output, shape index: {}]  }
   0x1   :  { %12 = vsyncpa [#allocation4], 0  ;;  %s531_s21 = smov [#allocation2]  }
   0x2   :  { %s18_s22 = sshll.u32 %s531_s21, 4  ;;  %s19_s22 = int_to_ptr.vmem [resolvable:$true] %s18_s22 }
   0x3   :  { %s495_s23 = scalar_lea.vmem %s19_s22, 128  ;;  %p500_p1 = scmp.lt.s32.totalorder %s19_s22, %s19_s22 }
   0x4   :  { %p496_p0 = scmp.ne.s32.totalorder %s19_s22, %s495_s23  ;;  %p501_p2 = scmp.lt.s32.totalorder %s495_s23, %s495_s23 }
   0x6   :  { %p502_p3 = por %p501_p2, %p500_p1 }
   0x8   :  { %p503_p4 = pnand %p502_p3, %p496_p0 }
   0xa   :  { %506 = shalt.err (!%p503_p4)
}
   0xb   :  { %s532_s24 = smov 64   ;;  %s533_s25 = smov 4  }
   0xc   :  { %24 = dma.hbm_to_vmem [thread:$0]  %s645_s0, 128, %s19_s22, [#allocation3], %s532_s24, %s532_s24, %s533_s25  }
   0xd   :  { %527 = dma.done.wait [#allocation3], 128  }
   0xe   :  { %528 = vsyncadd [#allocation3], 4294967168  ;;  %v534_v0 = vmov 0.0   ;;  %vm535_vm0 = vmmov 0   ;;  %v477_v1 = vld [vmem:[%s647_s2 + $0x8] sm:$0xff]   ;;  %v478_v2 = vld [vmem:[%s647_s2] sm:$0xff]  }
   0xf   :  { %431 = vmatprep.subr.bf16.mxu0 %v534_v0  ;;  %435 = vmatprep.mubr.msk.bf16.mxu0 %vm535_vm0, %v534_v0  ;;  %v592_v3 = vld [vmem:[%s646_s1] sm:$0xff]  ;;  %v597_v4 = vld [vmem:[%s646_s1 + $0x8] sm:$0xff]  ;;  %vm73_vm1 = vcmask 261120   ;;  %vm124_vm2 = vcmask 1043456   ;;  %vm214_vm3 = vcmask 523264   ;;  %vm120_vm4 = vcmask 64512  }
  0x10   :  { %439 = vmatprep.subr.bf16.mxu1 %v534_v0  ;;  %441 = vmatprep.mubr.msk.bf16.mxu1 %vm535_vm0, %v534_v0  ;;  %v417_v5 = vpack.c.bf16 %v597_v4, %v592_v3  ;;  %v43_v6 = vld [vmem:[#allocation2] sm:$0xf]  ;;  %v44_v11 = vld [vmem:[#allocation2 + $0x4] sm:$0xf] }
  0x11   :  { %432 = vmatpush3.bf16.msra.mxu0 %v477_v1  ;;  %v126_v7 = vsel %vm124_vm2, %v43_v6, 0  ;;  %v242_v8 = vsel %vm214_vm3, %v43_v6, 0  ;;  %v406_v9 = vld [vmem:[%s648_s3] ss:$0 sm:$0xff]  ;;  %v172_v15 = vsel %vm124_vm2, %v44_v11, 0  ;;  %v287_v40 = vsel %vm214_vm3, %v44_v11, 0 }
  0x12   :  { %433 = vmatprep.subr.bf16.mxu0 %v534_v0  ;;  %440 = vmatpush3.bf16.msra.mxu1 %v126_v7  ;;  %v330_v49 = vld [vmem:[%s649_s4] sm:$0xf]  ;;  %s536_s4 = smov [#allocation5]  }
  0x13   :  { %445 = vmatprep.subr.bf16.mxu1 %v534_v0  ;;  %v342_v50 = vsel %vm124_vm2, %v330_v49, 0  ;;  %v415_v60 = vld [vmem:[%s650_s5] ss:$0 sm:$0xff]  ;;  %s394_s14 = sshll.u32 %s536_s4, 4  ;;  %s395_s14 = int_to_ptr.vmem [resolvable:$true] %s394_s14 }
  0x14   :  { %s507_s15 = scalar_lea.vmem %s395_s14, 256  ;;  %p512_p6 = scmp.lt.s32.totalorder %s395_s14, %s395_s14 }
  0x15   :  { %434 = vmatpush3.bf16.msra.mxu0 %v478_v2  ;;  %p508_p5 = scmp.ne.s32.totalorder %s395_s14, %s507_s15  ;;  %p513_p7 = scmp.lt.s32.totalorder %s507_s15, %s507_s15 }
  0x16   :  { %451 = vmatprep.subr.bf16.mxu0 %v534_v0 }
  0x17   :  { %p514_p8 = por %p513_p7, %p512_p6 }
  0x18   :  { %436 = vmatmul.mubr.msk.bf16.vlgmr.msra.gmra.mxu0 %vm73_vm1, %v417_v5 }
  0x19   :  { %453 = vmatprep.mubr.msk.bf16.mxu0 %vm535_vm0, %v534_v0  ;;  %452 = vmatpush3.bf16.xpose.msra.mxu0 %v242_v8  ;;  %p515_p9 = pnand %p514_p8, %p508_p5 }
  0x1a   :  { %463 = vmatprep.subr.bf16.mxu0 %v534_v0 }
  0xd8   :  { %v111_v10 = vpop.f32.mrf.mxu0 }
  0xd9   :  { %v112_v12 = vadd.f32 %v406_v9, %v111_v10 }
  0xda   :  { %v437_v13 = vpop.f32.mrf.mxu0 }
  0xdb   :  { %v118_v14 = vpack.c.bf16 %v112_v12, %v112_v12 }
  0xdc   :  { %v114_v16 = vpop.f32.mrf.mxu0 }
  0xdd   :  { %442 = vmatmul.mubr.msk.bf16.vlgmr.msra.gmra.mxu1 %vm120_vm4, %v118_v14  ;;  %v115_v18 = vadd.f32 %v406_v9, %v114_v16 }
  0xde   :  { %446 = vmatpush3.bf16.msra.mxu1 %v172_v15  ;;  %v438_v17 = vpop.f32.mrf.mxu0  ;;  %447 = vmatprep.mubr.msk.bf16.mxu1 %vm535_vm0, %v534_v0 }
  0xdf   :  { %457 = vmatprep.subr.bf16.mxu1 %v534_v0  ;;  %v119_v19 = vpack.c.bf16 %v115_v18, %v115_v18 }
  0xe5   :  { %448 = vmatmul.mubr.msk.bf16.vlgmr.msra.gmra.mxu1 %vm120_vm4, %v119_v19 }
  0xe6   :  { %459 = vmatprep.mubr.msk.bf16.mxu1 %vm535_vm0, %v534_v0  ;;  %458 = vmatpush3.bf16.xpose.msra.mxu1 %v287_v40 }
 0x19d   :  { %v162_v20 = vpop.f32.mrf.mxu1 }
 0x19e   :  { %v215_v21 = vsel %vm214_vm3, %v162_v20, -inf }
 0x19f   :  { %216 = vmax.xlane.f32.xlu0 %v215_v21  ;;  %v443_v22 = vpop.f32.mrf.mxu1 }
 0x1a1   :  { %v165_v23 = vpop.f32.mrf.mxu1 }
 0x1a3   :  { %v444_v24 = vpop.f32.mrf.mxu1 }
 0x1a5   :  { %v208_v25 = vpop.f32.mrf.mxu1 }
 0x1a6   :  { %v218_v26 = vsel %vm214_vm3, %v208_v25, -inf }
 0x1a7   :  { %219 = vmax.xlane.f32.xlu0 %v218_v26  ;;  %v449_v27 = vpop.f32.mrf.mxu1 }
 0x1a9   :  { %v211_v28 = vpop.f32.mrf.mxu1 }
 0x1ab   :  { %v450_v29 = vpop.f32.mrf.mxu1 }
 0x228   :  { %v217_v30 = vpop.xlane.xlu0 %216 }
 0x229   :  { %v221_v31 = vsub.f32 %v162_v20, %v217_v30 }
 0x22b   :  { %v223_v32 = vmul.f32 1.442695, %v221_v31 }
 0x22d   :  { %479 = vpow2.f32 %v223_v32 }
 0x230   :  { %v220_v33 = vpop.xlane.xlu0 %219 }
 0x231   :  { %v222_v34 = vsub.f32 %v208_v25, %v220_v33 }
 0x233   :  { %v225_v35 = vmul.f32 1.442695, %v222_v34 }
 0x235   :  { %481 = vpow2.f32 %v225_v35 }
 0x23a   :  { %v480_v36 = vpop.eup %479 }
 0x23b   :  { %v227_v37 = vsel %vm214_vm3, %v480_v36, 0.0 }
 0x23c   :  { %228 = vadd.xlane.f32.xlu1 %v227_v37 }
 0x242   :  { %v482_v38 = vpop.eup %481 }
 0x243   :  { %v230_v39 = vsel %vm214_vm3, %v482_v38, 0.0 }
 0x244   :  { %231 = vadd.xlane.f32.xlu1 %v230_v39 }
 0x2c5   :  { %v229_v41 = vpop.xlane.xlu1 %228 }
 0x2c6   :  { %483 = vrcp.f32 %v229_v41 }
 0x2cd   :  { %v232_v42 = vpop.xlane.xlu1 %231 }
 0x2ce   :  { %485 = vrcp.f32 %v232_v42 }
 0x2d3   :  { %v484_v43 = vpop.eup %483 }
 0x2d4   :  { %v235_v44 = vmul.f32 %v484_v43, %v480_v36 }
 0x2d6   :  { %v237_v45 = vpack.c.bf16 %v235_v44, %v235_v44 }
 0x2d8   :  { %454 = vmatmul.mubr.msk.bf16.vlgmr.msra.gmra.mxu0 %vm214_vm3, %v237_v45 }
 0x2d9   :  { %465 = vmatprep.mubr.msk.bf16.mxu0 %vm535_vm0, %v534_v0  ;;  %464 = vmatpush3.bf16.msra.mxu0 %v342_v50 }
 0x2db   :  { %v486_v46 = vpop.eup %485 }
 0x2dc   :  { %v236_v47 = vmul.f32 %v486_v46, %v482_v38 }
 0x2de   :  { %v238_v48 = vpack.c.bf16 %v236_v47, %v236_v47 }
 0x2e0   :  { %460 = vmatmul.mubr.msk.bf16.vlgmr.msra.gmra.mxu1 %vm214_vm3, %v238_v48 }
 0x398   :  { %v278_v51 = vpop.f32.mrf.mxu0 }
 0x39a   :  { %v455_v52 = vpop.f32.mrf.mxu0 }
 0x39c   :  { %v281_v53 = vpop.f32.mrf.mxu0 }
 0x39e   :  { %v456_v54 = vpop.f32.mrf.mxu0 }
 0x3a0   :  { %v323_v55 = vpop.f32.mrf.mxu1 }
 0x3a1   :  { %v329_v56 = vpack.c.bf16 %v323_v55, %v278_v51 }
 0x3a2   :  { %v461_v57 = vpop.f32.mrf.mxu1 }
 0x3a3   :  { %466 = vmatmul.mubr.msk.bf16.vlgmr.msra.gmra.mxu0 %vm120_vm4, %v329_v56 }
 0x3a4   :  { %v326_v58 = vpop.f32.mrf.mxu1 }
 0x3a6   :  { %v462_v59 = vpop.f32.mrf.mxu1 }
 0x463   :  { %v378_v61 = vpop.f32.mrf.mxu0 }
 0x464   :  { %v379_v62 = vadd.f32 %v415_v60, %v378_v61 }
 0x465   :  { %v467_v63 = vpop.f32.mrf.mxu0 }
 0x466   :  { %v385_v0 = vadd.f32 %v379_v62, %v592_v3 }
 0x467   :  { %v381_v1 = vpop.f32.mrf.mxu0 }
 0x468   :  { %387 = vst.msk [vmem:[#allocation5] sm:$0xff] %vm73_vm1, %v385_v0  ;;  %v382_v2 = vadd.f32 %v415_v60, %v381_v1 }
 0x469   :  { %v468_v5 = vpop.f32.mrf.mxu0 }
 0x46a   :  { %v386_v6 = vadd.f32 %v382_v2, %v597_v4 }
 0x46c   :  { %388 = vst.msk [vmem:[#allocation5 + $0x8] sm:$0xff] %vm73_vm1, %v386_v6 }
 0x46d   :  { %518 = shalt.err (!%p515_p9)
}
 0x46e   :  { %s537_s5 = smov 128   ;;  %s538_s16 = smov 8  }
 0x46f   :  { %400 = dma.vmem_to_hbm [thread:$0]  %s395_s14, 256, %s651_s6, [#allocation4], %s537_s5, %s537_s5, %s538_s16  }
 0x470   :  { %529 = dma.done.wait [#allocation4], 256  }
 0x471   :  { %530 = vsyncadd [#allocation4], 4294967040 }
 0x472   :  { %404 = vsyncpa [#allocation3], 1 }
 0x473   :  { %405 = vsyncpa [#allocation4], 1 }

</bundles_post_ra>
